<compile_context>
chip_gen: v5e
topology: v5e:2x2
jax: 0.10.0
libtpu: 0.0.40
codegen_flags: <defaults>
</compile_context>

<pallas_src>
import math

import jax
import jax.numpy as jnp
from jax.experimental import pallas as pl
from jax.experimental.pallas import tpu as pltpu


def _timestep_embedder_kernel(t_ref, freqs_ref, w1_ref, b1_ref, w2_ref, b2_ref, o_ref):
    # t_ref:     (TN, 1)       timesteps for this row tile
    # freqs_ref: (1, half)     sinusoid frequencies
    # w1_ref:    (2*half, H)   first Linear weight (x @ W layout)
    # b1_ref:    (1, H)
    # w2_ref:    (H, H)        second Linear weight
    # b2_ref:    (1, H)
    # o_ref:     (TN, H)
    t = t_ref[...].astype(jnp.float32)                              # (TN, 1)
    args = t * freqs_ref[...]                                       # (TN, half)
    emb = jnp.concatenate([jnp.cos(args), jnp.sin(args)], axis=-1)  # (TN, 2*half)

    h = jnp.dot(emb, w1_ref[...], preferred_element_type=jnp.float32) + b1_ref[...]
    h = h * (1.0 / (1.0 + jnp.exp(-h)))                             # SiLU = x * sigmoid(x)
    out = jnp.dot(h, w2_ref[...], preferred_element_type=jnp.float32) + b2_ref[...]
    o_ref[...] = out.astype(o_ref.dtype)


def timestep_embedder(t, w1, b1, w2, b2, *, frequency_embedding_size=256,
                      max_period=10000, row_tile=256):
    """Forward pass of TimestepEmbedder.

    t:  (N,) scalar timesteps (any float/int dtype)
    w1: (frequency_embedding_size, H), b1: (H,)   -- first Linear, x @ W + b layout
    w2: (H, H),                        b2: (H,)   -- second Linear
    Returns (N, H) float32.
    """
    N = int(t.shape[0])
    half = frequency_embedding_size // 2
    H = w2.shape[-1]

    # Sinusoid frequencies (tiny, computed once outside the kernel).
    freqs = jnp.exp(
        -math.log(max_period) * jnp.arange(half, dtype=jnp.float32) / half
    ).reshape(1, half)

    # Odd frequency_embedding_size appends a zero column to the embedding in the
    # PyTorch module; that column only multiplies the last row of w1, so dropping
    # that row is numerically identical (default 256 is even, so this is a no-op).
    if frequency_embedding_size % 2:
        w1 = w1[:-1]

    w1 = w1.astype(jnp.float32)
    w2 = w2.astype(jnp.float32)
    b1 = b1.astype(jnp.float32).reshape(1, H)
    b2 = b2.astype(jnp.float32).reshape(1, H)

    # Row (batch) tiling: multiple of 8 sublanes, capped at `row_tile` rows so the
    # per-step footprint stays far under scoped VMEM on every generation
    # (v5e 16 MiB / v6e 32 MiB / v7x 32 MiB defaults).  Row tiles are independent
    # -> "parallel" (shards across v7x's 2 TensorCores; no-op on v5e/v6e).
    tn = min(row_tile, max(8, ((N + 7) // 8) * 8))
    n_pad = pl.cdiv(N, tn) * tn
    t2d = t.astype(jnp.float32).reshape(N, 1)
    if n_pad != N:
        t2d = jnp.pad(t2d, ((0, n_pad - N), (0, 0)))

    d_emb = w1.shape[0]  # == 2 * half

    out = pl.pallas_call(
        _timestep_embedder_kernel,
        out_shape=jax.ShapeDtypeStruct((n_pad, H), jnp.float32),
        grid=(n_pad // tn,),
        in_specs=[
            pl.BlockSpec((tn, 1), lambda i: (i, 0)),      # t rows for this tile
            pl.BlockSpec((1, half), lambda i: (0, 0)),    # freqs   (VMEM-resident)
            pl.BlockSpec((d_emb, H), lambda i: (0, 0)),   # w1      (VMEM-resident)
            pl.BlockSpec((1, H), lambda i: (0, 0)),       # b1
            pl.BlockSpec((H, H), lambda i: (0, 0)),       # w2      (VMEM-resident)
            pl.BlockSpec((1, H), lambda i: (0, 0)),       # b2
        ],
        out_specs=pl.BlockSpec((tn, H), lambda i: (i, 0)),
        compiler_params=pltpu.CompilerParams(
            dimension_semantics=("parallel",),
            vmem_limit_bytes=32 * 1024 * 1024,
        ),
    )(t2d, freqs, w1, b1, w2, b2)

    return out[:N]


def _timestep_embedder_ref(t, w1, b1, w2, b2, *, frequency_embedding_size=256,
                           max_period=10000):
    """Pure-JAX reference mirroring the PyTorch module exactly."""
    half = frequency_embedding_size // 2
    freqs = jnp.exp(-math.log(max_period) * jnp.arange(half, dtype=jnp.float32) / half)
    args = t.astype(jnp.float32)[:, None] * freqs[None]
    emb = jnp.concatenate([jnp.cos(args), jnp.sin(args)], axis=-1)
    if frequency_embedding_size % 2:
        emb = jnp.concatenate([emb, jnp.zeros_like(emb[:, :1])], axis=-1)
    h = emb @ w1 + b1
    h = h * jax.nn.sigmoid(h)
    return h @ w2 + b2


if __name__ == "__main__":
    key = jax.random.PRNGKey(0)
    k_t, k_w1, k_b1, k_w2, k_b2 = jax.random.split(key, 5)

    N = 8      # batch of timesteps
    D = 256    # frequency_embedding_size (module default)
    H = 128    # hidden_size (small, lane-dense)

    t = jax.random.uniform(k_t, (N,), jnp.float32, minval=0.0, maxval=1000.0)
    w1 = jax.random.normal(k_w1, (D, H), jnp.float32) * (1.0 / math.sqrt(D))
    b1 = jax.random.normal(k_b1, (H,), jnp.float32) * 0.02
    w2 = jax.random.normal(k_w2, (H, H), jnp.float32) * (1.0 / math.sqrt(H))
    b2 = jax.random.normal(k_b2, (H,), jnp.float32) * 0.02

    y = timestep_embedder(t, w1, b1, w2, b2, frequency_embedding_size=D)
    y = jax.block_until_ready(y)

    ref = _timestep_embedder_ref(t, w1, b1, w2, b2, frequency_embedding_size=D)
    assert y.shape == (N, H) and y.dtype == jnp.float32
    max_err = jnp.max(jnp.abs(y - ref))
    assert jnp.allclose(y, ref, rtol=5e-3, atol=5e-3), f"mismatch vs reference: {max_err}"

    print("KERNEL_OK")
</pallas_src>

<mosaic_0001>
module attributes {stable_mosaic.version = 11 : i64} {
  func.func @_timestep_embedder_kernel(%arg0: i32, %arg1: memref<8x1xf32, #tpu.memory_space<vmem>>, %arg2: memref<1x128xf32, #tpu.memory_space<vmem>>, %arg3: memref<256x128xf32, #tpu.memory_space<vmem>>, %arg4: memref<1x128xf32, #tpu.memory_space<vmem>>, %arg5: memref<128x128xf32, #tpu.memory_space<vmem>>, %arg6: memref<1x128xf32, #tpu.memory_space<vmem>>, %arg7: memref<8x128xf32, #tpu.memory_space<vmem>>) attributes {dimension_semantics = [#tpu.dimension_semantics<parallel>], iteration_bounds = array<i64: 1>, scalar_prefetch = 0 : i64, scratch_operands = 0 : i64, tpu.core_type = #tpu.core_type<tc>, window_params = [{transform_indices = @transform_0, window_bounds = array<i64: 8, 1>}, {pipeline_mode = #tpu.pipeline_mode<synchronous>, transform_indices = @transform_1, window_bounds = array<i64: 1, 128>}, {pipeline_mode = #tpu.pipeline_mode<synchronous>, transform_indices = @transform_2, window_bounds = array<i64: 256, 128>}, {pipeline_mode = #tpu.pipeline_mode<synchronous>, transform_indices = @transform_3, window_bounds = array<i64: 1, 128>}, {pipeline_mode = #tpu.pipeline_mode<synchronous>, transform_indices = @transform_4, window_bounds = array<i64: 128, 128>}, {pipeline_mode = #tpu.pipeline_mode<synchronous>, transform_indices = @transform_5, window_bounds = array<i64: 1, 128>}, {transform_indices = @transform_6, window_bounds = array<i64: 8, 128>}]} {
    %c0 = arith.constant 0 : index
    %c0_0 = arith.constant 0 : index
    %0 = vector.load %arg1[%c0, %c0_0] : memref<8x1xf32, #tpu.memory_space<vmem>>, vector<8x1xf32>
    %c0_1 = arith.constant 0 : index
    %c0_2 = arith.constant 0 : index
    %1 = vector.load %arg2[%c0_1, %c0_2] : memref<1x128xf32, #tpu.memory_space<vmem>>, vector<1x128xf32>
    %2 = vector.broadcast %0 : vector<8x1xf32> to vector<8x128xf32>
    %3 = vector.broadcast %1 : vector<1x128xf32> to vector<8x128xf32>
    %4 = arith.mulf %2, %3 : vector<8x128xf32>
    %5 = math.cos %4 : vector<8x128xf32>
    %6 = math.sin %4 : vector<8x128xf32>
    %7 = tpu.concatenate %5, %6 in 1 : vector<8x128xf32>, vector<8x128xf32> -> vector<8x256xf32>
    %c0_3 = arith.constant 0 : index
    %c0_4 = arith.constant 0 : index
    %8 = vector.load %arg3[%c0_3, %c0_4] : memref<256x128xf32, #tpu.memory_space<vmem>>, vector<256x128xf32>
    %cst = arith.constant dense<0.000000e+00> : vector<8x128xf32>
    %9 = tpu.matmul %7, %8, %cst {dimension_numbers = #tpu.dot_dimension_numbers<[1], [0], [0], [1], [0, 0, 1, 1], [], []>} : vector<8x256xf32>, vector<256x128xf32>, vector<8x128xf32> -> vector<8x128xf32>
    %c0_5 = arith.constant 0 : index
    %c0_6 = arith.constant 0 : index
    %10 = vector.load %arg4[%c0_5, %c0_6] : memref<1x128xf32, #tpu.memory_space<vmem>>, vector<1x128xf32>
    %11 = vector.broadcast %10 : vector<1x128xf32> to vector<8x128xf32>
    %12 = arith.addf %9, %11 : vector<8x128xf32>
    %cst_7 = arith.constant 0.000000e+00 : f32
    %13 = vector.broadcast %cst_7 : f32 to vector<8x128xf32>
    %14 = arith.subf %13, %12 : vector<8x128xf32>
    %15 = math.exp %14 : vector<8x128xf32>
    %cst_8 = arith.constant 1.000000e+00 : f32
    %16 = vector.broadcast %cst_8 : f32 to vector<8x128xf32>
    %17 = arith.addf %16, %15 : vector<8x128xf32>
    %cst_9 = arith.constant 1.000000e+00 : f32
    %18 = vector.broadcast %cst_9 : f32 to vector<8x128xf32>
    %19 = arith.divf %18, %17 : vector<8x128xf32>
    %20 = arith.mulf %12, %19 : vector<8x128xf32>
    %c0_10 = arith.constant 0 : index
    %c0_11 = arith.constant 0 : index
    %21 = vector.load %arg5[%c0_10, %c0_11] : memref<128x128xf32, #tpu.memory_space<vmem>>, vector<128x128xf32>
    %cst_12 = arith.constant dense<0.000000e+00> : vector<8x128xf32>
    %22 = tpu.matmul %20, %21, %cst_12 {dimension_numbers = #tpu.dot_dimension_numbers<[1], [0], [0], [1], [0, 0, 1, 1], [], []>} : vector<8x128xf32>, vector<128x128xf32>, vector<8x128xf32> -> vector<8x128xf32>
    %c0_13 = arith.constant 0 : index
    %c0_14 = arith.constant 0 : index
    %23 = vector.load %arg6[%c0_13, %c0_14] : memref<1x128xf32, #tpu.memory_space<vmem>>, vector<1x128xf32>
    %24 = vector.broadcast %23 : vector<1x128xf32> to vector<8x128xf32>
    %25 = arith.addf %22, %24 : vector<8x128xf32>
    %c0_15 = arith.constant 0 : index
    %c0_16 = arith.constant 0 : index
    %26 = vector.load %arg7[%c0_15, %c0_16] : memref<8x128xf32, #tpu.memory_space<vmem>>, vector<8x128xf32>
    tpu.vector_store %arg7[%c0_15, %c0_16], %25 {strides = array<i32>} : memref<8x128xf32, #tpu.memory_space<vmem>>, vector<8x128xf32>,
    return
  }
  func.func @transform_0(%arg0: i32) -> (i32, i32) {
    %c0_i32 = arith.constant 0 : i32
    %c0_i32_0 = arith.constant 0 : i32
    return %arg0, %c0_i32 : i32, i32
  }
  func.func @transform_1(%arg0: i32) -> (i32, i32) {
    %c0_i32 = arith.constant 0 : i32
    %c0_i32_0 = arith.constant 0 : i32
    %c0_i32_1 = arith.constant 0 : i32
    return %c0_i32, %c0_i32_0 : i32, i32
  }
  func.func @transform_2(%arg0: i32) -> (i32, i32) {
    %c0_i32 = arith.constant 0 : i32
    %c0_i32_0 = arith.constant 0 : i32
    %c0_i32_1 = arith.constant 0 : i32
    return %c0_i32, %c0_i32_0 : i32, i32
  }
  func.func @transform_3(%arg0: i32) -> (i32, i32) {
    %c0_i32 = arith.constant 0 : i32
    %c0_i32_0 = arith.constant 0 : i32
    %c0_i32_1 = arith.constant 0 : i32
    return %c0_i32, %c0_i32_0 : i32, i32
  }
  func.func @transform_4(%arg0: i32) -> (i32, i32) {
    %c0_i32 = arith.constant 0 : i32
    %c0_i32_0 = arith.constant 0 : i32
    %c0_i32_1 = arith.constant 0 : i32
    return %c0_i32, %c0_i32_0 : i32, i32
  }
  func.func @transform_5(%arg0: i32) -> (i32, i32) {
    %c0_i32 = arith.constant 0 : i32
    %c0_i32_0 = arith.constant 0 : i32
    %c0_i32_1 = arith.constant 0 : i32
    return %c0_i32, %c0_i32_0 : i32, i32
  }
  func.func @transform_6(%arg0: i32) -> (i32, i32) {
    %c0_i32 = arith.constant 0 : i32
    %c0_i32_0 = arith.constant 0 : i32
    return %arg0, %c0_i32 : i32, i32
  }
}

</mosaic_0001>

<bundles_post_ra>
// kernel: tpu_custom_call.1
= control target key start
LH: loop header
LB: loop body
LE: loop exit
PB: predicated region body
PF: predicated region fallthrough
CT: control target
= control target key end

     0   :  { %11 = vsyncpa [#allocation3], 0  ;;  %s764_s0 = inlined_call_operand.vmem [shape: f32[8,1], index: 0, kind: input, shape index: {}]   ;;  %s765_s1 = inlined_call_operand.vmem [shape: f32[1,128], index: 1, kind: input, shape index: {}]   ;;  %s766_s2 = inlined_call_operand.hbm [shape: f32[256,128], index: 2, kind: input, shape index: {}]   ;;  %s767_s3 = inlined_call_operand.vmem [shape: f32[1,128], index: 3, kind: input, shape index: {}]   ;;  %s768_s4 = inlined_call_operand.hbm [shape: f32[128,128], index: 4, kind: input, shape index: {}]   ;;  %s769_s5 = inlined_call_operand.vmem [shape: f32[1,128], index: 5, kind: input, shape index: {}]   ;;  %s770_s6 = inlined_call_operand.hbm [shape: f32[8,128], index: 6, kind: output, shape index: {}]  }
   0x1   :  { %12 = vsyncpa [#allocation6], 0 }
   0x2   :  { %13 = vsyncpa [#allocation4], 0  ;;  %s22_s23 = sshll.u32 %s766_s2, 4  ;;  %s635_s24 = smov [#allocation2]   ;;  %s23_s23 = int_to_ptr.hbm [resolvable:$true] %s22_s23 }
   0x3   :  { %s24_s25 = sshll.u32 %s635_s24, 4  ;;  %s37_s28 = sshll.u32 %s768_s4, 4  ;;  %s25_s25 = int_to_ptr.vmem [resolvable:$true] %s24_s25  ;;  %s38_s28 = int_to_ptr.hbm [resolvable:$true] %s37_s28 }
   0x4   :  { %s636_s29 = smov 128   ;;  %s637_s30 = smov 8  }
   0x5   :  { %30 = dma.hbm_to_vmem [thread:$0]  %s23_s23, 4096, %s25_s25, [#allocation3], %s636_s29, %s636_s29, %s637_s30  }
   0x6   :  { %s638_s7 = smov [#allocation5]  }
   0x7   :  { %s39_s8 = sshll.u32 %s638_s7, 4  ;;  %s40_s8 = int_to_ptr.vmem [resolvable:$true] %s39_s8 }
   0x8   :  { %45 = dma.hbm_to_vmem [thread:$0]  %s38_s28, 2048, %s40_s8, [#allocation6], %s636_s29, %s636_s29, %s637_s30  }
   0x9   :  { %629 = dma.done.wait [#allocation3], 4096  }
   0xa   :  { %630 = vsyncadd [#allocation3], 4294963200 }
   0xb   :  { %631 = dma.done.wait [#allocation6], 2048  }
   0xc   :  { %632 = vsyncadd [#allocation6], 4294965248  ;;  %v639_v0 = vmov 0   ;;  %v56_v1 = vld [vmem:[%s764_s0] sm:$0xff]  ;;  %v391_v2 = vld [vmem:[#allocation2 + $0x78] sm:$0xff]  ;;  %s646_s12 = smov [#allocation7]  }
   0xd   :  { %549 = vset.pattern.permute.xlu0 %v639_v0  ;;  %v407_v3 = vld [vmem:[#allocation2 + $0xf8] sm:$0xff]  ;;  %v390_v4 = vld [vmem:[#allocation2 + $0x70] sm:$0xff]  ;;  %412 = vmatpush.msra.mxu0 %v391_v2  ;;  %v389_v6 = vld [vmem:[#allocation2 + $0x68] sm:$0xff]  ;;  %v640_v46 = vmov 2102212464   ;;  %s518_s13 = sshll.u32 %s646_s12, 4  ;;  %s519_s13 = int_to_ptr.vmem [resolvable:$true] %s518_s13 }
   0xe   :  { %60 = vperm.xlu0 %549, %v56_v1   ;;  %432 = vmatpush.msra.mxu1 %v407_v3  ;;  %v406_v5 = vld [vmem:[#allocation2 + $0xf0] sm:$0xff]  ;;  %v405_v7 = vld [vmem:[#allocation2 + $0xe8] sm:$0xff]  ;;  %v388_v8 = vld [vmem:[#allocation2 + $0x60] sm:$0xff]  ;;  %v641_v48 = vmov 920167782   ;;  %s520_s16 = sshll.u32 %s770_s6, 4  ;;  %s521_s16 = int_to_ptr.hbm [resolvable:$true] %s520_s16 }
   0xf   :  { %413 = vmatpush.msra.mxu0 %v390_v4  ;;  %v404_v9 = vld [vmem:[#allocation2 + $0xe0] sm:$0xff]  ;;  %v387_v10 = vld [vmem:[#allocation2 + $0x58] sm:$0xff]  ;;  %v386_v13 = vld [vmem:[#allocation2 + $0x50] sm:$0xff]  ;;  %v642_v50 = vmov 683565275  }
  0x10   :  { %433 = vmatpush.msra.mxu1 %v406_v5  ;;  %v403_v11 = vld [vmem:[#allocation2 + $0xd8] sm:$0xff]  ;;  %v550_v12 = vld [vmem:[%s765_s1] ss:$0 sm:$0xff]  ;;  %v402_v14 = vld [vmem:[#allocation2 + $0xd0] sm:$0xff]  ;;  %v643_v53 = vmov 1326507024  }
  0x11   :  { %414 = vmatpush.msra.mxu0 %v389_v6  ;;  %v385_v15 = vld [vmem:[#allocation2 + $0x48] sm:$0xff]  ;;  %v384_v19 = vld [vmem:[#allocation2 + $0x40] sm:$0xff]  ;;  %v383_v22 = vld [vmem:[#allocation2 + $0x38] sm:$0xff]  ;;  %v644_v57 = vmov 2475754826  }
  0x12   :  { %434 = vmatpush.msra.mxu1 %v405_v7  ;;  %v401_v16 = vld [vmem:[#allocation2 + $0xc8] sm:$0xff]  ;;  %v400_v20 = vld [vmem:[#allocation2 + $0xc0] sm:$0xff]  ;;  %v399_v23 = vld [vmem:[#allocation2 + $0xb8] sm:$0xff]  ;;  %v645_v60 = vmov 2131351028  }
  0x13   :  { %415 = vmatpush.msra.mxu0 %v388_v8  ;;  %v382_v25 = vld [vmem:[#allocation2 + $0x30] sm:$0xff]  ;;  %v381_v28 = vld [vmem:[#allocation2 + $0x28] sm:$0xff]  ;;  %v380_v32 = vld [vmem:[#allocation2 + $0x20] sm:$0xff] }
  0x14   :  { %435 = vmatpush.msra.mxu1 %v404_v9  ;;  %v398_v26 = vld [vmem:[#allocation2 + $0xb0] sm:$0xff]  ;;  %v397_v29 = vld [vmem:[#allocation2 + $0xa8] sm:$0xff]  ;;  %v396_v33 = vld [vmem:[#allocation2 + $0xa0] sm:$0xff] }
  0x15   :  { %416 = vmatpush.msra.mxu0 %v387_v10  ;;  %v379_v34 = vld [vmem:[#allocation2 + $0x18] sm:$0xff]  ;;  %v378_v39 = vld [vmem:[#allocation2 + $0x10] sm:$0xff]  ;;  %v377_v42 = vld [vmem:[#allocation2 + $0x8] sm:$0xff] }
  0x16   :  { %436 = vmatpush.msra.mxu1 %v403_v11  ;;  %v395_v35 = vld [vmem:[#allocation2 + $0x98] sm:$0xff]  ;;  %v394_v40 = vld [vmem:[#allocation2 + $0x90] sm:$0xff]  ;;  %v393_v43 = vld [vmem:[#allocation2 + $0x88] sm:$0xff] }
  0x17   :  { %417 = vmatpush.msra.mxu0 %v386_v13  ;;  %v376_v55 = vld [vmem:[#allocation2] sm:$0xff] }
  0x18   :  { %437 = vmatpush.msra.mxu1 %v402_v14  ;;  %v392_v56 = vld [vmem:[#allocation2 + $0x80] sm:$0xff] }
  0x19   :  { %418 = vmatpush.msra.mxu0 %v385_v15 }
  0x1a   :  { %438 = vmatpush.msra.mxu1 %v401_v16 }
  0x1b   :  { %419 = vmatpush.msra.mxu0 %v384_v19 }
  0x1c   :  { %439 = vmatpush.msra.mxu1 %v400_v20 }
  0x1d   :  { %420 = vmatpush.msra.mxu0 %v383_v22 }
  0x1e   :  { %440 = vmatpush.msra.mxu1 %v399_v23 }
  0x1f   :  { %421 = vmatpush.msra.mxu0 %v382_v25 }
  0x20   :  { %441 = vmatpush.msra.mxu1 %v398_v26 }
  0x21   :  { %422 = vmatpush.msra.mxu0 %v381_v28 }
  0x22   :  { %442 = vmatpush.msra.mxu1 %v397_v29 }
  0x23   :  { %423 = vmatpush.msra.mxu0 %v380_v32 }
  0x24   :  { %443 = vmatpush.msra.mxu1 %v396_v33 }
  0x25   :  { %424 = vmatpush.msra.mxu0 %v379_v34 }
  0x26   :  { %444 = vmatpush.msra.mxu1 %v395_v35 }
  0x27   :  { %425 = vmatpush.msra.mxu0 %v378_v39 }
  0x28   :  { %445 = vmatpush.msra.mxu1 %v394_v40 }
  0x29   :  { %426 = vmatpush.msra.mxu0 %v377_v42 }
  0x2a   :  { %446 = vmatpush.msra.mxu1 %v393_v43 }
  0x2b   :  { %427 = vmatpush.msra.mxu0 %v376_v55 }
  0x2c   :  { %447 = vmatpush.msra.mxu1 %v392_v56 }
  0x80   :  { %v61_v17 = vpop.permute.xlu0 %60 }
  0x81   :  { %v695_v18 = vmul.f32 %v550_v12, %v61_v17 }
  0x83   :  { %v70_v21 = vand.u32 2139095040, %v695_v18  ;;  %v67_v30 = vand.u32 2147483647, %v695_v18  ;;  %vm69_vm12 = vcmp.lt.s32.totalorder %v695_v18, 0 }
  0x85   :  { %v71_v24 = vshrl.u32 %v70_v21, 23  ;;  %v74_v36 = vand.u32 8388607, %v67_v30  ;;  %vm68_vm13 = vcmp.le.f32.partialorder %v67_v30, 0.7853982 }
  0x87   :  { %v531_v27 = vadd.s32 4294967169, %v71_v24  ;;  %v75_v44 = vor.u32 8388608, %v74_v36 }
  0x89   :  { %v77_v31 = vadd.s32 1, %v531_v27  ;;  %v711_v4 = vshll.u32 %v75_v44, 8 }
  0x8b   :  { %vm78_vm0 = vcmp.gt.s32.totalorder %v77_v31, 0  ;;  %v116_v14 = vand.u32 65535, %v711_v4  ;;  %v117_v16 = vshrl.u32 %v711_v4, 16 }
  0x8c   :  { %v79_v37 = vsel %vm78_vm0, %v77_v31, 0 }
  0x8d   :  { %v81_v38 = vand.u32 31, %v79_v37  ;;  %v703_v45 = vshrl.u32 %v79_v37, 5 }
  0x8f   :  { %v701_v41 = vsub.s32 32, %v81_v38  ;;  %v93_v47 = vshll.u32 %v640_v46, %v81_v38  ;;  %v96_v49 = vshll.u32 %v641_v48, %v81_v38  ;;  %v84_v51 = vshll.u32 %v642_v50, %v81_v38 }
  0x90   :  { %v87_v59 = vshll.u32 %v644_v57, %v81_v38  ;;  %v90_v62 = vshll.u32 %v645_v60, %v81_v38  ;;  %vm102_vm1 = vcmp.lt.s32.totalorder %v703_v45, 4  ;;  %vm99_vm2 = vcmp.lt.s32.totalorder %v703_v45, 1 }
  0x91   :  { %v94_v52 = vshrl.u32 %v641_v48, %v701_v41  ;;  %v97_v54 = vshrl.u32 %v643_v53, %v701_v41  ;;  %v85_v58 = vshrl.u32 %v644_v57, %v701_v41  ;;  %v88_v61 = vshrl.u32 %v645_v60, %v701_v41 }
  0x92   :  { %v91_v63 = vshrl.u32 %v640_v46, %v701_v41  ;;  %vm101_vm3 = vcmp.lt.s32.totalorder %v703_v45, 3  ;;  %vm100_vm4 = vcmp.lt.s32.totalorder %v703_v45, 2  ;;  %v83_v42 = vshrl.u32 %v642_v50, %v701_v41 }
  0x93   :  { %v95_v1 = vor.u32 %v94_v52, %v93_v47  ;;  %v98_v2 = vor.u32 %v97_v54, %v96_v49  ;;  %v86_v3 = vor.u32 %v85_v58, %v84_v51  ;;  %v89_v5 = vor.u32 %v88_v61, %v87_v59 }
  0x94   :  { %v92_v6 = vor.u32 %v91_v63, %v90_v62 }
  0x95   :  { %v108_v7 = vsel %vm102_vm1, %v95_v1, 920167782  ;;  %v112_v8 = vsel %vm102_vm1, %v98_v2, 1326507024  ;;  %v107_v9 = vsel %vm99_vm2, %v86_v3, %v89_v5  ;;  %v103_v49 = vsel %vm99_vm2, %v83_v42, %v86_v3 }
  0x96   :  { %v109_v10 = vsel %vm101_vm3, %v92_v6, %v108_v7  ;;  %v111_v11 = vsel %vm99_vm2, %v89_v5, %v92_v6  ;;  %v113_v13 = vsel %vm101_vm3, %v95_v1, %v112_v8  ;;  %v104_v38 = vsel %vm102_vm1, %v92_v6, 2102212464 }
  0x97   :  { %v110_v12 = vsel %vm100_vm4, %v107_v9, %v109_v10  ;;  %v114_v15 = vsel %vm100_vm4, %v111_v11, %v113_v13  ;;  %v105_v51 = vsel %vm101_vm3, %v89_v5, %v104_v38 }
  0x98   :  { %v140_v17 = vand.u32 65535, %v110_v12  ;;  %v141_v19 = vshrl.u32 %v110_v12, 16  ;;  %v118_v20 = vand.u32 65535, %v114_v15  ;;  %v119_v21 = vshrl.u32 %v114_v15, 16 }
  0x99   :  { %v106_v50 = vsel %vm100_vm4, %v103_v49, %v105_v51  ;;  %vm210_vm4 = vweird.f32 %v695_v18 }
  0x9a   :  { %v143_v22 = vmul.u32 %v141_v19, %v116_v14  ;;  %v144_v23 = vmul.u32 %v140_v17, %v117_v16  ;;  %v121_v24 = vmul.u32 %v119_v21, %v116_v14  ;;  %v122_v25 = vmul.u32 %v118_v20, %v117_v16 }
  0x9b   :  { %v142_v26 = vmul.u32 %v140_v17, %v116_v14  ;;  %v120_v28 = vmul.u32 %v118_v20, %v116_v14  ;;  %v145_v31 = vmul.u32 %v141_v19, %v117_v16  ;;  %v123_v32 = vmul.u32 %v119_v21, %v117_v16 }
  0x9c   :  { %v146_v27 = vshll.u32 %v143_v22, 16  ;;  %v124_v29 = vshll.u32 %v121_v24, 16  ;;  %v148_v33 = vshll.u32 %v144_v23, 16  ;;  %v126_v35 = vshll.u32 %v122_v25, 16 }
  0x9d   :  { %v147_v47 = vshrl.u32 %v143_v22, 16  ;;  %v125_v52 = vshrl.u32 %v121_v24, 16  ;;  %v149_v54 = vshrl.u32 %v144_v23, 16  ;;  %v127_v56 = vshrl.u32 %v122_v25, 16 }
  0x9e   :  { %vm150_vm5 = vc.u32 %v142_v26, %v146_v27  ;;  %v152_v34 = vadd.s32 %v146_v27, %v142_v26  ;;  %vm128_vm6 = vc.u32 %v120_v28, %v124_v29  ;;  %v130_v36 = vadd.s32 %v124_v29, %v120_v28 }
  0x9f   :  { %v151_v37 = vsel %vm150_vm5, 1, %v639_v0  ;;  %v129_v39 = vsel %vm128_vm6, 1, %v639_v0  ;;  %v160_v60 = vmul.u32 %v711_v4, %v106_v50  ;;  %v486_v50 = vld [vmem:[#allocation5 + $0x70] sm:$0xff] }
  0xa0   :  { %v153_v40 = vadd.s32 %v151_v37, %v145_v31  ;;  %vm154_vm7 = vc.u32 %v152_v34, %v148_v33  ;;  %v131_v43 = vadd.s32 %v129_v39, %v123_v32  ;;  %vm132_vm8 = vc.u32 %v130_v36, %v126_v35 }
  0xa1   :  { %v155_v44 = vsel %vm154_vm7, 1, %v639_v0  ;;  %v133_v46 = vsel %vm132_vm8, 1, %v639_v0  ;;  %v156_v0 = vadd.s32 %v152_v34, %v148_v33 }
  0xa2   :  { %v157_v48 = vadd.s32 %v155_v44, %v153_v40  ;;  %v135_v53 = vadd.s32 %v133_v46, %v131_v43 }
  0xa4   :  { %v158_v55 = vadd.s32 %v157_v48, %v147_v47  ;;  %v136_v41 = vadd.s32 %v135_v53, %v125_v52 }
  0xa6   :  { %v159_v57 = vadd.s32 %v158_v55, %v149_v54  ;;  %v137_v58 = vadd.s32 %v136_v41, %v127_v56  ;;  %v487_v41 = vld [vmem:[#allocation5 + $0x78] sm:$0xff] }
  0xa7   :  { %492 = vmatpush.msra.mxu2 %v487_v41 }
  0xa8   :  { %v163_v59 = vadd.s32 1, %v159_v57  ;;  %vm162_vm9 = vc.u32 %v137_v58, %v156_v0  ;;  %v161_v9 = vadd.s32 %v156_v0, %v137_v58  ;;  %v484_v58 = vld [vmem:[#allocation5 + $0x60] sm:$0xff]  ;;  %v483_v0 = vld [vmem:[#allocation5 + $0x58] sm:$0xff] }
  0xa9   :  { %493 = vmatpush.msra.mxu2 %v486_v50 }
  0xaa   :  { %v164_v61 = vsel %vm162_vm9, %v163_v59, %v159_v57  ;;  %v485_v57 = vld [vmem:[#allocation5 + $0x68] sm:$0xff]  ;;  %v482_v59 = vld [vmem:[#allocation5 + $0x50] sm:$0xff] }
  0xab   :  { %v165_v62 = vadd.s32 %v164_v61, %v160_v60  ;;  %494 = vmatpush.msra.mxu2 %v485_v57  ;;  %v481_v60 = vld [vmem:[#allocation5 + $0x48] sm:$0xff]  ;;  %v479_v61 = vld [vmem:[#allocation5 + $0x38] sm:$0xff] }
  0xad   :  { %v166_v63 = vadd.s32 536870912, %v165_v62  ;;  %495 = vmatpush.msra.mxu2 %v484_v58 }
  0xaf   :  { %v167_v1 = vshrl.u32 %v166_v63, 30  ;;  %496 = vmatpush.msra.mxu2 %v483_v0  ;;  %v477_v63 = vld [vmem:[#allocation5 + $0x28] sm:$0xff] }
  0xb1   :  { %v168_v2 = vshll.u32 %v167_v1, 30  ;;  %v191_v23 = vsub.s32 4, %v167_v1  ;;  %497 = vmatpush.msra.mxu2 %v482_v59 }
  0xb3   :  { %v169_v3 = vsub.s32 %v165_v62, %v168_v2  ;;  %v192_v28 = vsel %vm69_vm12, %v191_v23, %v167_v1  ;;  %498 = vmatpush.msra.mxu2 %v481_v60  ;;  %v478_v62 = vld [vmem:[#allocation5 + $0x30] sm:$0xff]  ;;  %v476_v1 = vld [vmem:[#allocation5 + $0x20] sm:$0xff] }
  0xb4   :  { %v194_v32 = vsel %vm68_vm13, 0, %v192_v28  ;;  %v551_v2 = vld [vmem:[%s767_s3] ss:$0 sm:$0xff] }
  0xb5   :  { %vm170_vm10 = vcmp.lt.s32.totalorder %v169_v3, 0  ;;  %v171_v5 = vsub.s32 0, %v169_v3  ;;  %v365_v37 = vadd.s32 3, %v194_v32  ;;  %v211_v42 = vand.u32 3, %v194_v32 }
  0xb7   :  { %v172_v6 = vsel %vm170_vm10, %v171_v5, %v169_v3  ;;  %v366_v43 = vand.u32 3, %v365_v37  ;;  %vm212_vm14 = vcmp.lt.s32.totalorder %v211_v42, 2  ;;  %vm213_vm15 = vcmp.eq.s32.totalorder %v211_v42, 0 }
  0xb8   :  { %v173_v7 = vclz %v172_v6  ;;  %vm216_vm0 = vcmp.eq.s32.totalorder %v211_v42, 2  ;;  %v474_v6 = vld [vmem:[#allocation5 + $0x10] sm:$0xff] }
  0xb9   :  { %vm367_vm1 = vcmp.lt.s32.totalorder %v366_v43, 2  ;;  %vm368_vm2 = vcmp.eq.s32.totalorder %v366_v43, 0  ;;  %vm371_vm3 = vcmp.eq.s32.totalorder %v366_v43, 2 }
  0xba   :  { %v532_v8 = vadd.s32 4294967294, %v173_v7 }
  0xbc   :  { %vm533_vm11 = vcmp.lt.s32.totalorder %v532_v8, 0 }
  0xbd   :  { %v176_v45 = vsel %vm533_vm11, 0, %v532_v8 }
  0xbe   :  { %v177_v10 = vsub.s32 32, %v176_v45  ;;  %v181_v11 = vsub.s32 4294967266, %v176_v45  ;;  %v178_v12 = vshll.u32 %v169_v3, %v176_v45  ;;  %v475_v3 = vld [vmem:[#allocation5 + $0x18] sm:$0xff]  ;;  %v473_v45 = vld [vmem:[#allocation5 + $0x8] sm:$0xff] }
  0xc0   :  { %v179_v13 = vshrl.u32 %v161_v9, %v177_v10  ;;  %v182_v4 = vadd.s32 127, %v181_v11  ;;  %v472_v10 = vld [vmem:[#allocation5] sm:$0xff] }
  0xc2   :  { %v180_v14 = vor.u32 %v179_v13, %v178_v12  ;;  %v183_v15 = vshll.u32 %v182_v4, 23 }
  0xc4   :  { %v184_v16 = vor.u32 4788187, %v183_v15  ;;  %v187_v19 = vcvt.s32.f32 %v180_v14 }
  0xc6   :  { %v185_v17 = vand.u32 2147483647, %v184_v16 }
  0xc8   :  { %v188_v20 = vmul.f32 %v187_v19, %v185_v17 }
  0xca   :  { %v189_v21 = vxor.u32 2147483648, %v188_v20 }
  0xcc   :  { %v190_v22 = vsel %vm69_vm12, %v189_v21, %v188_v20 }
  0xcd   :  { %v193_v24 = vsel %vm68_vm13, %v695_v18, %v190_v22  ;;  %v480_v18 = vld [vmem:[#allocation5 + $0x40] sm:$0xff] }
  0xce   :  { %v195_v25 = vmul.f32 %v193_v24, %v193_v24  ;;  %499 = vmatpush.msra.mxu2 %v480_v18 }
  0xd0   :  { %v196_v26 = vmul.f32 -0.001358992, %v195_v25  ;;  %v203_v27 = vmul.f32 -0.00019511016, %v195_v25  ;;  %500 = vmatpush.msra.mxu2 %v479_v61 }
  0xd2   :  { %v197_v29 = vadd.f32 0.041655596, %v196_v26  ;;  %v204_v31 = vadd.f32 0.008332121, %v203_v27  ;;  %501 = vmatpush.msra.mxu2 %v478_v62  ;;  %v552_v26 = vld [vmem:[%s769_s5] ss:$0 sm:$0xff] }
  0xd4   :  { %v198_v33 = vmul.f32 %v197_v29, %v195_v25  ;;  %v205_v34 = vmul.f32 %v204_v31, %v195_v25  ;;  %502 = vmatpush.msra.mxu2 %v477_v63 }
  0xd6   :  { %v199_v35 = vadd.f32 -0.4999988, %v198_v33  ;;  %v206_v36 = vadd.f32 -0.16666654, %v205_v34  ;;  %503 = vmatpush.msra.mxu2 %v476_v1 }
  0xd8   :  { %v200_v38 = vmul.f32 %v199_v35, %v195_v25  ;;  %v207_v39 = vmul.f32 %v206_v36, %v195_v25  ;;  %504 = vmatpush.msra.mxu2 %v475_v3 }
  0xda   :  { %v201_v40 = vadd.f32 1.0, %v200_v38  ;;  %v208_v30 = vadd.f32 1.0, %v207_v39  ;;  %505 = vmatpush.msra.mxu2 %v474_v6 }
  0xdc   :  { %v209_v44 = vmul.f32 %v208_v30, %v193_v24  ;;  %v217_v46 = vxor.u32 2147483648, %v201_v40  ;;  %506 = vmatpush.msra.mxu2 %v473_v45 }
  0xde   :  { %v214_v47 = vxor.u32 2147483648, %v209_v44  ;;  %v218_v49 = vsel %vm216_vm0, %v217_v46, %v209_v44  ;;  %v373_v52 = vsel %vm371_vm3, %v217_v46, %v209_v44  ;;  %507 = vmatpush.msra.mxu2 %v472_v10 }
  0xe0   :  { %v215_v48 = vsel %vm213_vm15, %v201_v40, %v214_v47  ;;  %v370_v51 = vsel %vm368_vm2, %v201_v40, %v214_v47 }
  0xe1   :  { %v219_v53 = vsel %vm212_vm14, %v215_v48, %v218_v49  ;;  %v374_v54 = vsel %vm367_vm1, %v370_v51, %v373_v52 }
  0xe2   :  { %v220_v55 = vsel %vm210_vm4, nan, %v219_v53  ;;  %v375_v56 = vsel %vm210_vm4, nan, %v374_v54 }
  0xe3   :  { %428 = vmatmul.f32.vlgmr.msra.gmra.mxu0 %v220_v55  ;;  %448 = vmatmul.f32.vlgmr.msra.gmra.mxu1 %v375_v56 }
 0x160   :  { %v429_v5 = vpop.f32.mrf.mxu0  ;;  %v449_v8 = vpop.f32.mrf.mxu1 }
 0x161   :  { %v430_v7 = vadd.f32 %v551_v2, %v429_v5 }
 0x163   :  { %v450_v9 = vadd.f32 %v449_v8, %v430_v7 }
 0x165   :  { %v452_v11 = vsub.f32 0.0, %v450_v9 }
 0x167   :  { %v453_v12 = vmul.f32 1.442695, %v452_v11 }
 0x169   :  { %553 = vpow2.f32 %v453_v12 }
 0x16f   :  { %v554_v13 = vpop.eup %553 }
 0x170   :  { %v455_v4 = vadd.f32 1.0, %v554_v13 }
 0x172   :  { %555 = vrcp.f32 %v455_v4  ;;  %v467_v17 = vand.u32 2147483648, %v455_v4  ;;  %v465_v20 = vand.u32 2147483647, %v455_v4  ;;  %vm461_vm6 = vweird.f32 %v455_v4 }
 0x174   :  { %v468_v22 = vor.u32 1.1754944e-38, %v467_v17  ;;  %vm466_vm8 = vcmp.eq.f32.partialorder %v465_v20, 8.507059e+37 }
 0x178   :  { %v556_v14 = vpop.eup %555 }
 0x179   :  { %v457_v15 = vmul.f32 %v556_v14, %v455_v4  ;;  %vm462_vm5 = vweird.f32 %v556_v14 }
 0x17a   :  { %vm463_vm7 = vmor %vm461_vm6, %vm462_vm5 }
 0x17b   :  { %v458_v16 = vsub.f32 1.0, %v457_v15 }
 0x17d   :  { %v459_v19 = vmul.f32 %v556_v14, %v458_v16 }
 0x17f   :  { %v460_v21 = vadd.f32 %v556_v14, %v459_v19 }
 0x181   :  { %v464_v23 = vsel %vm463_vm7, %v556_v14, %v460_v21 }
 0x182   :  { %v469_v24 = vsel %vm466_vm8, %v468_v22, %v464_v23 }
 0x183   :  { %v471_v25 = vmul.f32 %v469_v24, %v450_v9 }
 0x185   :  { %508 = vmatmul.f32.vlgmr.msra.gmra.mxu2 %v471_v25 }
 0x208   :  { %v509_v27 = vpop.f32.mrf.mxu2 }
 0x209   :  { %v510_v28 = vadd.f32 %v552_v26, %v509_v27 }
 0x20b   :  { %512 = vst [vmem:[#allocation7] sm:$0xff] %v510_v28 }
 0x20c   :  { %523 = dma.vmem_to_hbm [thread:$0]  %s519_s13, 128, %s521_s16, [#allocation4]  }
 0x20d   :  { %633 = dma.done.wait [#allocation4], 128  }
 0x20e   :  { %634 = vsyncadd [#allocation4], 4294967168 }
 0x20f   :  { %528 = vsyncpa [#allocation3], 1 }
 0x210   :  { %529 = vsyncpa [#allocation6], 1 }
 0x211   :  { %530 = vsyncpa [#allocation4], 1 }

</bundles_post_ra>
